<compile_context>
chip_gen: v7x
topology: tpu7x:2x2x1
jax: 0.10.0
libtpu: 0.0.40
codegen_flags: <defaults>
</compile_context>

<pallas_src>
import functools

import jax
import jax.numpy as jnp
from jax.experimental import pallas as pl
from jax.experimental.pallas import tpu as pltpu


def _round_up(n, m):
    return (n + m - 1) // m * m


def _cdiv(a, b):
    return (a + b - 1) // b


def _param_spec(shape):
    """VMEM-resident param tile (constant index_map), single-buffered if supported."""
    try:
        return pl.BlockSpec(shape, lambda i: (0, 0), pipeline_mode=pl.Buffered(1))
    except TypeError:  # older jax without pipeline_mode kwarg
        return pl.BlockSpec(shape, lambda i: (0, 0))


def _fused_mlp_kernel(*refs, num_layers):
    """refs = (x_ref, w0, b0, w1, b1, ..., w_{L-1}, b_{L-1}, o_ref)."""
    x_ref = refs[0]
    o_ref = refs[-1]

    h = x_ref[...]                                    # bf16 [tb, F0_pad]
    for i in range(num_layers):
        w_ref = refs[1 + 2 * i]                       # [Fi_pad, Fo_pad], bf16
        b_ref = refs[2 + 2 * i]                       # [8, Fo_pad], f32 (row-replicated)
        z = jnp.dot(h.astype(w_ref.dtype), w_ref[...],
                    preferred_element_type=jnp.float32)
        z = z + b_ref[0:1, :]                         # f32 epilogue (safe on v5e)
        if i < num_layers - 1:
            h = jnp.maximum(z, 0.0)
        else:
            # Padded output lanes already carry the -1e30 folded into the final
            # bias, so exp() kills them -- no in-kernel masking needed.
            m = jnp.max(z, axis=-1, keepdims=True)
            e = jnp.exp(z - m)
            denom = jnp.sum(e, axis=-1, keepdims=True)
            o_ref[...] = (e / denom).astype(o_ref.dtype)   # exact normalization


def _pack_params(params, compute_dtype):
    """One-time pad/cast of all (W, b). Done once, outside the per-call path."""
    dims = [params[0][0].shape[0]] + [w.shape[1] for (w, _) in params]
    dims_pad = [_round_up(d, 128) for d in dims]      # lane-dense feature dims
    packed = []
    for idx, (w, b) in enumerate(params):
        fi, fo = w.shape
        fi_p, fo_p = dims_pad[idx], dims_pad[idx + 1]
        w_p = (jnp.zeros((fi_p, fo_p), jnp.float32)
               .at[:fi, :fo].set(w).astype(compute_dtype))
        b_row = jnp.zeros((fo_p,), jnp.float32).at[:fo].set(b.reshape(-1))
        if idx == len(params) - 1 and fo_p > fo:
            # Softmax lane mask folded into the final bias: padded weight columns
            # are zero, so z_pad == -1e30 and exp() of it is exactly 0.
            b_row = b_row.at[fo:].set(-1e30)
        b_p = jnp.asarray(jnp.broadcast_to(b_row[None, :], (8, fo_p)))  # full (8,128) tile
        packed += [w_p, b_p]
    return packed, dims_pad


def _fused_forward(x, packed, dims_pad, num_layers, out_dim, batch_tile, compute_dtype):
    B, fin = x.shape

    # Batch tiling: sublane multiple of 8, >= 2 grid steps when B allows
    # (v7x megacore sharding), padding limited to a few sublane rows.
    b8 = _round_up(B, 8)
    nsteps = max(_cdiv(b8, batch_tile), 2 if b8 >= 16 else 1)
    tb = _round_up(_cdiv(b8, nsteps), 8)
    b_pad = tb * nsteps

    x_p = (jnp.zeros((b_pad, dims_pad[0]), compute_dtype)
           .at[:B, :fin].set(x.astype(compute_dtype)))

    # x streams per grid step (default double-buffering); raise to pl.Buffered(3)
    # only if profiling shows the x-tile DMA exposed.
    in_specs = [pl.BlockSpec((tb, dims_pad[0]), lambda i: (i, 0))]
    resident_bytes = 0
    for li in range(num_layers):
        w_p, b_p = packed[2 * li], packed[2 * li + 1]
        in_specs.append(_param_spec(w_p.shape))
        in_specs.append(_param_spec(b_p.shape))
        resident_bytes += (w_p.size * w_p.dtype.itemsize
                           + b_p.size * b_p.dtype.itemsize)

    out_specs = pl.BlockSpec((tb, dims_pad[-1]), lambda i: (i, 0))
    out_shape = jax.ShapeDtypeStruct((b_pad, dims_pad[-1]), jnp.float32)

    # VMEM plan: resident params + double-buffered x/out tiles + activation
    # scratch (f32 act + bf16 cast copy per layer), capped per chip generation.
    itemsize = jnp.dtype(compute_dtype).itemsize
    stream_bytes = 2 * tb * (dims_pad[0] * itemsize + dims_pad[-1] * 4)
    act_bytes = 2 * tb * max(dims_pad) * (4 + itemsize)
    need = resident_bytes + stream_bytes + act_bytes
    try:
        phys = int(pltpu.get_tpu_info().vmem_capacity_bytes)
    except Exception:
        phys = 64 << 20                         # conservative (v7x per-TC size)
    cap = phys * 3 // 4                         # headroom for compiler scratch
    vmem_limit = int(min(max(2 * need, 16 << 20), cap))
    # TODO(synk): if resident weights ever exceed `cap`, tile the widest layer over
    # its output-feature dim with an inner pltpu.emit_pipeline loop instead.

    kernel = functools.partial(_fused_mlp_kernel, num_layers=num_layers)
    out = pl.pallas_call(
        kernel,
        out_shape=out_shape,
        grid=(b_pad // tb,),
        in_specs=in_specs,
        out_specs=out_specs,
        compiler_params=pltpu.CompilerParams(
            dimension_semantics=("parallel",),   # v7x: shard batch over both TCs
            vmem_limit_bytes=vmem_limit),
    )(x_p, *packed)
    return out[:B, :out_dim]


def make_feedforward_softmax_net(params, *, batch_tile=512, compute_dtype=jnp.bfloat16):
    """Pack params once; return a jitted forward(x) -> softmax probs [B, out_dim]."""
    packed, dims_pad = _pack_params(params, compute_dtype)
    num_layers = len(params)
    out_dim = params[-1][0].shape[1]

    @jax.jit
    def _jitted(x, *packed_args):
        return _fused_forward(x, packed_args, dims_pad, num_layers, out_dim,
                              batch_tile, compute_dtype)

    return lambda x: _jitted(x, *packed)


def init_params(network, key):
    """nn.Linear-style U(-1/sqrt(fan_in), 1/sqrt(fan_in)) init; W stored [in, out]."""
    params = []
    for idx in range(len(network) - 1):
        fan_in, fan_out = network[idx], network[idx + 1]
        key, kw, kb = jax.random.split(key, 3)
        bound = 1.0 / jnp.sqrt(fan_in)
        w = jax.random.uniform(kw, (fan_in, fan_out), jnp.float32, -bound, bound)
        b = jax.random.uniform(kb, (1, fan_out), jnp.float32, -bound, bound)
        params.append((w, b))
    return params


def reference_forward(x, params, compute_dtype=jnp.bfloat16):
    """Pure-JAX reference following the same bf16-matmul / f32-epilogue path."""
    h = x
    for i, (w, b) in enumerate(params):
        z = jnp.dot(h.astype(compute_dtype), w.astype(compute_dtype),
                    preferred_element_type=jnp.float32) + b.reshape(1, -1)
        if i < len(params) - 1:
            h = jnp.maximum(z, 0.0)
        else:
            h = jax.nn.softmax(z, axis=-1)
    return h


if __name__ == "__main__":
    network = [16, 32, 32, 8]   # layer widths (the PyTorch ctor's `network` arg)
    batch = 8

    key = jax.random.PRNGKey(0)
    key, kx = jax.random.split(key)
    x = jax.random.normal(kx, (batch, network[0]), jnp.float32)
    params = init_params(network, key)

    forward = make_feedforward_softmax_net(params)
    out = jax.block_until_ready(forward(x))
    ref = reference_forward(x, params)

    assert out.shape == (batch, network[-1])
    assert bool(jnp.all(jnp.isfinite(out)))
    # exact-divide softmax -> rows sum to 1 up to f32 rounding
    assert jnp.allclose(jnp.sum(out, axis=-1), 1.0, atol=1e-4)
    # matches the pure-JAX reference that follows the same bf16-matmul path
    assert jnp.allclose(out, ref, atol=5e-3)
    print("KERNEL_OK")
</pallas_src>

<mosaic_0001>
module attributes {stable_mosaic.version = 11 : i64} {
  func.func @_fused_mlp_kernel(%arg0: i32, %arg1: memref<8x128xbf16, #tpu.memory_space<vmem>>, %arg2: memref<128x128xbf16, #tpu.memory_space<vmem>>, %arg3: memref<8x128xf32, #tpu.memory_space<vmem>>, %arg4: memref<128x128xbf16, #tpu.memory_space<vmem>>, %arg5: memref<8x128xf32, #tpu.memory_space<vmem>>, %arg6: memref<128x128xbf16, #tpu.memory_space<vmem>>, %arg7: memref<8x128xf32, #tpu.memory_space<vmem>>, %arg8: memref<8x128xf32, #tpu.memory_space<vmem>>) attributes {dimension_semantics = [#tpu.dimension_semantics<parallel>], iteration_bounds = array<i64: 1>, scalar_prefetch = 0 : i64, scratch_operands = 0 : i64, tpu.core_type = #tpu.core_type<tc>, window_params = [{transform_indices = @transform_0, window_bounds = array<i64: 8, 128>}, {pipeline_mode = #tpu.pipeline_mode<synchronous>, transform_indices = @transform_1, window_bounds = array<i64: 128, 128>}, {pipeline_mode = #tpu.pipeline_mode<synchronous>, transform_indices = @transform_2, window_bounds = array<i64: 8, 128>}, {pipeline_mode = #tpu.pipeline_mode<synchronous>, transform_indices = @transform_3, window_bounds = array<i64: 128, 128>}, {pipeline_mode = #tpu.pipeline_mode<synchronous>, transform_indices = @transform_4, window_bounds = array<i64: 8, 128>}, {pipeline_mode = #tpu.pipeline_mode<synchronous>, transform_indices = @transform_5, window_bounds = array<i64: 128, 128>}, {pipeline_mode = #tpu.pipeline_mode<synchronous>, transform_indices = @transform_6, window_bounds = array<i64: 8, 128>}, {transform_indices = @transform_7, window_bounds = array<i64: 8, 128>}]} {
    %c0 = arith.constant 0 : index
    %c0_0 = arith.constant 0 : index
    %0 = vector.load %arg1[%c0, %c0_0] : memref<8x128xbf16, #tpu.memory_space<vmem>>, vector<8x128xbf16>
    %c0_1 = arith.constant 0 : index
    %c0_2 = arith.constant 0 : index
    %1 = vector.load %arg2[%c0_1, %c0_2] : memref<128x128xbf16, #tpu.memory_space<vmem>>, vector<128x128xbf16>
    %cst = arith.constant dense<0.000000e+00> : vector<8x128xf32>
    %2 = tpu.matmul %0, %1, %cst {dimension_numbers = #tpu.dot_dimension_numbers<[1], [0], [0], [1], [0, 0, 1, 1], [], []>} : vector<8x128xbf16>, vector<128x128xbf16>, vector<8x128xf32> -> vector<8x128xf32>
    %c0_3 = arith.constant 0 : index
    %c0_4 = arith.constant 0 : index
    %3 = vector.load %arg3[%c0_3, %c0_4] : memref<8x128xf32, #tpu.memory_space<vmem>>, vector<1x128xf32>
    %4 = vector.broadcast %3 : vector<1x128xf32> to vector<8x128xf32>
    %5 = arith.addf %2, %4 : vector<8x128xf32>
    %cst_5 = arith.constant 0.000000e+00 : f32
    %6 = vector.broadcast %cst_5 : f32 to vector<8x128xf32>
    %7 = arith.maximumf %5, %6 : vector<8x128xf32>
    %8 = arith.truncf %7 : vector<8x128xf32> to vector<8x128xbf16>
    %c0_6 = arith.constant 0 : index
    %c0_7 = arith.constant 0 : index
    %9 = vector.load %arg4[%c0_6, %c0_7] : memref<128x128xbf16, #tpu.memory_space<vmem>>, vector<128x128xbf16>
    %cst_8 = arith.constant dense<0.000000e+00> : vector<8x128xf32>
    %10 = tpu.matmul %8, %9, %cst_8 {dimension_numbers = #tpu.dot_dimension_numbers<[1], [0], [0], [1], [0, 0, 1, 1], [], []>} : vector<8x128xbf16>, vector<128x128xbf16>, vector<8x128xf32> -> vector<8x128xf32>
    %c0_9 = arith.constant 0 : index
    %c0_10 = arith.constant 0 : index
    %11 = vector.load %arg5[%c0_9, %c0_10] : memref<8x128xf32, #tpu.memory_space<vmem>>, vector<1x128xf32>
    %12 = vector.broadcast %11 : vector<1x128xf32> to vector<8x128xf32>
    %13 = arith.addf %10, %12 : vector<8x128xf32>
    %cst_11 = arith.constant 0.000000e+00 : f32
    %14 = vector.broadcast %cst_11 : f32 to vector<8x128xf32>
    %15 = arith.maximumf %13, %14 : vector<8x128xf32>
    %16 = arith.truncf %15 : vector<8x128xf32> to vector<8x128xbf16>
    %c0_12 = arith.constant 0 : index
    %c0_13 = arith.constant 0 : index
    %17 = vector.load %arg6[%c0_12, %c0_13] : memref<128x128xbf16, #tpu.memory_space<vmem>>, vector<128x128xbf16>
    %cst_14 = arith.constant dense<0.000000e+00> : vector<8x128xf32>
    %18 = tpu.matmul %16, %17, %cst_14 {dimension_numbers = #tpu.dot_dimension_numbers<[1], [0], [0], [1], [0, 0, 1, 1], [], []>} : vector<8x128xbf16>, vector<128x128xbf16>, vector<8x128xf32> -> vector<8x128xf32>
    %c0_15 = arith.constant 0 : index
    %c0_16 = arith.constant 0 : index
    %19 = vector.load %arg7[%c0_15, %c0_16] : memref<8x128xf32, #tpu.memory_space<vmem>>, vector<1x128xf32>
    %20 = vector.broadcast %19 : vector<1x128xf32> to vector<8x128xf32>
    %21 = arith.addf %18, %20 : vector<8x128xf32>
    %cst_17 = arith.constant dense<0xFF800000> : vector<8xf32>
    %22 = vector.multi_reduction <maximumf>, %21, %cst_17 [1] : vector<8x128xf32> to vector<8xf32>
    %23 = vector.shape_cast %22 : vector<8xf32> to vector<8x1xf32>
    %24 = vector.broadcast %23 : vector<8x1xf32> to vector<8x128xf32>
    %25 = arith.subf %21, %24 : vector<8x128xf32>
    %26 = math.exp %25 : vector<8x128xf32>
    %cst_18 = arith.constant dense<0.000000e+00> : vector<8xf32>
    %27 = vector.multi_reduction <add>, %26, %cst_18 [1] : vector<8x128xf32> to vector<8xf32>
    %28 = vector.shape_cast %27 : vector<8xf32> to vector<8x1xf32>
    %29 = vector.broadcast %28 : vector<8x1xf32> to vector<8x128xf32>
    %30 = arith.divf %26, %29 : vector<8x128xf32>
    %c0_19 = arith.constant 0 : index
    %c0_20 = arith.constant 0 : index
    %31 = vector.load %arg8[%c0_19, %c0_20] : memref<8x128xf32, #tpu.memory_space<vmem>>, vector<8x128xf32>
    tpu.vector_store %arg8[%c0_19, %c0_20], %30 {strides = array<i32>} : memref<8x128xf32, #tpu.memory_space<vmem>>, vector<8x128xf32>,
    return
  }
  func.func @transform_0(%arg0: i32) -> (i32, i32) {
    %c0_i32 = arith.constant 0 : i32
    %c0_i32_0 = arith.constant 0 : i32
    return %arg0, %c0_i32 : i32, i32
  }
  func.func @transform_1(%arg0: i32) -> (i32, i32) {
    %c0_i32 = arith.constant 0 : i32
    %c0_i32_0 = arith.constant 0 : i32
    %c0_i32_1 = arith.constant 0 : i32
    return %c0_i32, %c0_i32_0 : i32, i32
  }
  func.func @transform_2(%arg0: i32) -> (i32, i32) {
    %c0_i32 = arith.constant 0 : i32
    %c0_i32_0 = arith.constant 0 : i32
    %c0_i32_1 = arith.constant 0 : i32
    return %c0_i32, %c0_i32_0 : i32, i32
  }
  func.func @transform_3(%arg0: i32) -> (i32, i32) {
    %c0_i32 = arith.constant 0 : i32
    %c0_i32_0 = arith.constant 0 : i32
    %c0_i32_1 = arith.constant 0 : i32
    return %c0_i32, %c0_i32_0 : i32, i32
  }
  func.func @transform_4(%arg0: i32) -> (i32, i32) {
    %c0_i32 = arith.constant 0 : i32
    %c0_i32_0 = arith.constant 0 : i32
    %c0_i32_1 = arith.constant 0 : i32
    return %c0_i32, %c0_i32_0 : i32, i32
  }
  func.func @transform_5(%arg0: i32) -> (i32, i32) {
    %c0_i32 = arith.constant 0 : i32
    %c0_i32_0 = arith.constant 0 : i32
    %c0_i32_1 = arith.constant 0 : i32
    return %c0_i32, %c0_i32_0 : i32, i32
  }
  func.func @transform_6(%arg0: i32) -> (i32, i32) {
    %c0_i32 = arith.constant 0 : i32
    %c0_i32_0 = arith.constant 0 : i32
    %c0_i32_1 = arith.constant 0 : i32
    return %c0_i32, %c0_i32_0 : i32, i32
  }
  func.func @transform_7(%arg0: i32) -> (i32, i32) {
    %c0_i32 = arith.constant 0 : i32
    %c0_i32_0 = arith.constant 0 : i32
    return %arg0, %c0_i32 : i32, i32
  }
}

</mosaic_0001>

<bundles_post_ra>
// kernel: _jitted.1
= control target key start
LH: loop header
LB: loop body
LE: loop exit
PB: predicated region body
PF: predicated region fallthrough
CT: control target
= control target key end

     0   :  { %12 = vsyncpa [#allocation3], 0  ;;  %s825_s0 = inlined_call_operand.vmem [shape: bf16[8,128], index: 0, kind: input, shape index: {}]   ;;  %s826_s1 = inlined_call_operand.hbm [shape: bf16[128,128], index: 1, kind: input, shape index: {}]   ;;  %s827_s2 = inlined_call_operand.vmem [shape: f32[8,128], index: 2, kind: input, shape index: {}]   ;;  %s828_s3 = inlined_call_operand.hbm [shape: bf16[128,128], index: 3, kind: input, shape index: {}]   ;;  %s829_s4 = inlined_call_operand.vmem [shape: f32[8,128], index: 4, kind: input, shape index: {}]   ;;  %s830_s5 = inlined_call_operand.hbm [shape: bf16[128,128], index: 5, kind: input, shape index: {}]   ;;  %s831_s6 = inlined_call_operand.vmem [shape: f32[8,128], index: 6, kind: input, shape index: {}]   ;;  %s832_s7 = inlined_call_operand.hbm [shape: f32[8,128], index: 7, kind: output, shape index: {}]  }
   0x1   :  { %13 = vsyncpa [#allocation6], 0 }
   0x2   :  { %14 = vsyncpa [#allocation4], 0  ;;  %s671_s24 = smov [#allocation5]   ;;  %s672_s26 = smov [#allocation2]  }
   0x3   :  { %s36_s25 = sshll.u32 %s671_s24, 4  ;;  %s22_s27 = sshll.u32 %s672_s26, 4  ;;  %s37_s25 = int_to_ptr.vmem [resolvable:$true] %s36_s25  ;;  %s719_s27 = int_to_ptr.vmem [resolvable:$true] %s22_s27 }
   0x4   :  { %s577_s30 = scalar_lea.hbm %s828_s3, 1024 }
   0x5   :  { %p578_p0 = scmp.ne.s32.totalorder %s828_s3, %s577_s30  ;;  %p581_p1 = scmp.lt.u32.totalorder %s577_s30, %s828_s3 }
   0x7   :  { %p583_p2 = pnand %p581_p1, %p578_p0 }
   0x9   :  { %586 = shalt.err (!%p583_p2)
}
   0xa   :  { %s587_s12 = scalar_lea.vmem %s37_s25, 1024  ;;  %p592_p4 = scmp.lt.s32.totalorder %s37_s25, %s37_s25 }
   0xb   :  { %p588_p3 = scmp.ne.s32.totalorder %s37_s25, %s587_s12  ;;  %p593_p5 = scmp.lt.s32.totalorder %s587_s12, %s587_s12 }
   0xd   :  { %p594_p6 = por %p593_p5, %p592_p4 }
   0xf   :  { %p595_p7 = pnand %p594_p6, %p588_p3 }
  0x11   :  { %598 = shalt.err (!%p595_p7)
}
  0x12   :  { %s673_s13 = smov 64   ;;  %s674_s14 = smov 4  }
  0x13   :  { %42 = dma.hbm_to_vmem [thread:$0]  %s828_s3, 1024, %s37_s25, [#allocation6], %s673_s13, %s673_s13, %s674_s14  }
  0x14   :  { %s599_s19 = scalar_lea.hbm %s826_s1, 1024 }
  0x15   :  { %p600_p8 = scmp.ne.s32.totalorder %s826_s1, %s599_s19  ;;  %p603_p9 = scmp.lt.u32.totalorder %s599_s19, %s826_s1 }
  0x17   :  { %p605_p10 = pnand %p603_p9, %p600_p8 }
  0x19   :  { %608 = shalt.err (!%p605_p10)
}
  0x1a   :  { %s609_s24 = scalar_lea.vmem %s719_s27, 1024  ;;  %p614_p12 = scmp.lt.s32.totalorder %s719_s27, %s719_s27 }
  0x1b   :  { %p610_p11 = scmp.ne.s32.totalorder %s719_s27, %s609_s24  ;;  %p615_p13 = scmp.lt.s32.totalorder %s609_s24, %s609_s24 }
  0x1d   :  { %p616_p0 = por %p615_p13, %p614_p12 }
  0x1f   :  { %p617_p1 = pnand %p616_p0, %p610_p11 }
  0x21   :  { %620 = shalt.err (!%p617_p1)
}
  0x22   :  { %28 = dma.hbm_to_vmem [thread:$0]  %s826_s1, 1024, %s719_s27, [#allocation3], %s673_s13, %s673_s13, %s674_s14  }
  0x23   :  { %s675_s26 = smov [#allocation7]   ;;  %s621_s8 = scalar_lea.hbm %s830_s5, 1024 }
  0x24   :  { %s50_s28 = sshll.u32 %s675_s26, 4  ;;  %p622_p2 = scmp.ne.s32.totalorder %s830_s5, %s621_s8  ;;  %s51_s28 = int_to_ptr.vmem [resolvable:$true] %s50_s28 }
  0x25   :  { %p625_p3 = scmp.lt.u32.totalorder %s621_s8, %s830_s5 }
  0x27   :  { %p627_p4 = pnand %p625_p3, %p622_p2 }
  0x29   :  { %630 = shalt.err (!%p627_p4)
}
  0x2a   :  { %s631_s15 = scalar_lea.vmem %s51_s28, 1024  ;;  %p636_p6 = scmp.lt.s32.totalorder %s51_s28, %s51_s28 }
  0x2b   :  { %p632_p5 = scmp.ne.s32.totalorder %s51_s28, %s631_s15  ;;  %p637_p7 = scmp.lt.s32.totalorder %s631_s15, %s631_s15 }
  0x2d   :  { %p638_p8 = por %p637_p7, %p636_p6 }
  0x2f   :  { %p639_p9 = pnand %p638_p8, %p632_p5 }
  0x31   :  { %642 = shalt.err (!%p639_p9)
}
  0x32   :  { %56 = dma.hbm_to_vmem [thread:$0]  %s830_s5, 1024, %s51_s28, [#allocation6], %s673_s13, %s673_s13, %s674_s14  }
  0x33   :  { %665 = dma.done.wait [#allocation3], 1024  }
  0x34   :  { %666 = vsyncadd [#allocation3], 4294966272 }
  0x35   :  { %667 = dma.done.wait [#allocation6], 2048  }
  0x36   :  { %668 = vsyncadd [#allocation6], 4294965248  ;;  %v676_v0 = vmov 0.0   ;;  %vm677_vm0 = vmmov 0   ;;  %v549_v1 = vld [vmem:[#allocation2] sm:$0xff]   ;;  %v550_v2 = vld [vmem:[#allocation2 + $0x8] sm:$0xff]  }
  0x37   :  { %481 = vmatprep.subr.bf16.mxu0 %v676_v0  ;;  %497 = vmatprep.mubr.msk.bf16.mxu0 %vm677_vm0, %v676_v0  ;;  %v551_v3 = vld [vmem:[#allocation2 + $0x10] sm:$0xff]   ;;  %v557_v4 = vld [vmem:[#allocation5] sm:$0xff]   ;;  %v552_v5 = vld [vmem:[#allocation2 + $0x18] sm:$0xff]  }
  0x38   :  { %501 = vmatprep.subr.bf16.mxu1 %v676_v0  ;;  %517 = vmatprep.mubr.msk.bf16.mxu1 %vm677_vm0, %v676_v0  ;;  %v558_v6 = vld [vmem:[#allocation5 + $0x8] sm:$0xff]   ;;  %v553_v7 = vld [vmem:[#allocation2 + $0x20] sm:$0xff]   ;;  %v559_v8 = vld [vmem:[#allocation5 + $0x10] sm:$0xff]  }
  0x39   :  { %482 = vmatpush3.bf16.msra.mxu0 %v549_v1  ;;  %502 = vmatpush3.bf16.msra.mxu1 %v557_v4  ;;  %v554_v9 = vld [vmem:[#allocation2 + $0x28] sm:$0xff]   ;;  %v560_v10 = vld [vmem:[#allocation5 + $0x18] sm:$0xff]   ;;  %v555_v11 = vld [vmem:[#allocation2 + $0x30] sm:$0xff]  }
  0x3a   :  { %483 = vmatprep.subr.bf16.mxu0 %v676_v0  ;;  %503 = vmatprep.subr.bf16.mxu1 %v676_v0  ;;  %v561_v12 = vld [vmem:[#allocation5 + $0x20] sm:$0xff]   ;;  %v556_v13 = vld [vmem:[#allocation2 + $0x38] sm:$0xff]   ;;  %v562_v14 = vld [vmem:[#allocation5 + $0x28] sm:$0xff]  }
  0x3b   :  { %v69_v15 = vld [vmem:[%s825_s0] sm:$0xf]  ;;  %v563_v16 = vld [vmem:[#allocation5 + $0x30] sm:$0xff]   ;;  %v564_v17 = vld [vmem:[#allocation5 + $0x38] sm:$0xff]  }
  0x3c   :  { %v565_v18 = vld [vmem:[#allocation7] sm:$0xff]   ;;  %v566_v19 = vld [vmem:[#allocation7 + $0x8] sm:$0xff]   ;;  %v567_v20 = vld [vmem:[#allocation7 + $0x10] sm:$0xff]  }
  0x3d   :  { %484 = vmatpush3.bf16.msra.mxu0 %v550_v2  ;;  %504 = vmatpush3.bf16.msra.mxu1 %v558_v6  ;;  %v568_v21 = vld [vmem:[#allocation7 + $0x18] sm:$0xff]   ;;  %v569_v22 = vld [vmem:[#allocation7 + $0x20] sm:$0xff]   ;;  %v570_v23 = vld [vmem:[#allocation7 + $0x28] sm:$0xff]  }
  0x3e   :  { %485 = vmatprep.subr.bf16.mxu0 %v676_v0  ;;  %505 = vmatprep.subr.bf16.mxu1 %v676_v0  ;;  %v427_v24 = vld [vmem:[%s827_s2] ss:$0 sm:$0xff]  ;;  %v571_v32 = vld [vmem:[#allocation7 + $0x30] sm:$0xff]   ;;  %v572_v33 = vld [vmem:[#allocation7 + $0x38] sm:$0xff]  }
  0x3f   :  { %v436_v34 = vld [vmem:[%s829_s4] ss:$0 sm:$0xff]  ;;  %s678_s4 = smov [#allocation8]  }
  0x40   :  { %v445_v42 = vld [vmem:[%s831_s6] ss:$0 sm:$0xff]  ;;  %s417_s19 = sshll.u32 %s678_s4, 4  ;;  %s418_s19 = int_to_ptr.vmem [resolvable:$true] %s417_s19 }
  0x41   :  { %486 = vmatpush3.bf16.msra.mxu0 %v551_v3  ;;  %506 = vmatpush3.bf16.msra.mxu1 %v559_v8  ;;  %s643_s6 = scalar_lea.vmem %s418_s19, 128  ;;  %p648_p11 = scmp.lt.s32.totalorder %s418_s19, %s418_s19 }
  0x42   :  { %487 = vmatprep.subr.bf16.mxu0 %v676_v0  ;;  %507 = vmatprep.subr.bf16.mxu1 %v676_v0  ;;  %p644_p10 = scmp.ne.s32.totalorder %s418_s19, %s643_s6  ;;  %p649_p12 = scmp.lt.s32.totalorder %s643_s6, %s643_s6 }
  0x44   :  { %p650_p13 = por %p649_p12, %p648_p11 }
  0x45   :  { %488 = vmatpush3.bf16.msra.mxu0 %v552_v5  ;;  %508 = vmatpush3.bf16.msra.mxu1 %v560_v10 }
  0x46   :  { %489 = vmatprep.subr.bf16.mxu0 %v676_v0  ;;  %509 = vmatprep.subr.bf16.mxu1 %v676_v0  ;;  %p651_p0 = pnand %p650_p13, %p644_p10 }
  0x49   :  { %490 = vmatpush3.bf16.msra.mxu0 %v553_v7  ;;  %510 = vmatpush3.bf16.msra.mxu1 %v561_v12 }
  0x4a   :  { %491 = vmatprep.subr.bf16.mxu0 %v676_v0  ;;  %511 = vmatprep.subr.bf16.mxu1 %v676_v0 }
  0x4d   :  { %492 = vmatpush3.bf16.msra.mxu0 %v554_v9  ;;  %512 = vmatpush3.bf16.msra.mxu1 %v562_v14 }
  0x4e   :  { %493 = vmatprep.subr.bf16.mxu0 %v676_v0  ;;  %513 = vmatprep.subr.bf16.mxu1 %v676_v0 }
  0x51   :  { %494 = vmatpush3.bf16.msra.mxu0 %v555_v11  ;;  %514 = vmatpush3.bf16.msra.mxu1 %v563_v16 }
  0x52   :  { %495 = vmatprep.subr.bf16.mxu0 %v676_v0  ;;  %515 = vmatprep.subr.bf16.mxu1 %v676_v0 }
  0x55   :  { %496 = vmatpush3.bf16.msra.mxu0 %v556_v13  ;;  %516 = vmatpush3.bf16.msra.mxu1 %v564_v17 }
  0x56   :  { %521 = vmatprep.subr.bf16.mxu0 %v676_v0 }
  0x58   :  { %498 = vmatmul.mubr.bf16.vlgmr.msra.gmra.mrb[0].mxu0 %v69_v15 }
  0x59   :  { %537 = vmatprep.mubr.msk.bf16.mxu0 %vm677_vm0, %v676_v0  ;;  %522 = vmatpush3.bf16.msra.mxu0 %v565_v18 }
  0x5a   :  { %523 = vmatprep.subr.bf16.mxu0 %v676_v0 }
  0x5d   :  { %524 = vmatpush3.bf16.msra.mxu0 %v566_v19 }
  0x5e   :  { %525 = vmatprep.subr.bf16.mxu0 %v676_v0 }
  0x61   :  { %526 = vmatpush3.bf16.msra.mxu0 %v567_v20 }
  0x62   :  { %527 = vmatprep.subr.bf16.mxu0 %v676_v0 }
  0x65   :  { %528 = vmatpush3.bf16.msra.mxu0 %v568_v21 }
  0x66   :  { %529 = vmatprep.subr.bf16.mxu0 %v676_v0 }
  0x69   :  { %530 = vmatpush3.bf16.msra.mxu0 %v569_v22 }
  0x6a   :  { %531 = vmatprep.subr.bf16.mxu0 %v676_v0 }
  0x6d   :  { %532 = vmatpush3.bf16.msra.mxu0 %v570_v23 }
  0x6e   :  { %533 = vmatprep.subr.bf16.mxu0 %v676_v0 }
  0x71   :  { %534 = vmatpush3.bf16.msra.mxu0 %v571_v32 }
  0x72   :  { %535 = vmatprep.subr.bf16.mxu0 %v676_v0 }
  0x75   :  { %536 = vmatpush3.bf16.msra.mxu0 %v572_v33 }
 0x12b   :  { %v173_v25 = vpop.f32.mrb[0].mxu0 }
 0x12c   :  { %v174_v26 = vadd.f32 %v427_v24, %v173_v25  ;;  %v499_v27 = vpop.f32.mrb[1].mxu0 }
 0x12d   :  { %v176_v28 = vpop.f32.mrb[2].mxu0 }
 0x12e   :  { %v179_v29 = vmax.f32 %v174_v26, 0.0  ;;  %v500_v30 = vpop.f32.mrb[3].mxu0 }
 0x130   :  { %v180_v31 = vpack.c.bf16 %v179_v29, %v179_v29 }
 0x132   :  { %518 = vmatmul.mubr.bf16.vlgmr.msra.gmra.mrb[0].mxu1 %v180_v31 }
 0x205   :  { %v284_v35 = vpop.f32.mrb[0].mxu1 }
 0x206   :  { %v285_v36 = vadd.f32 %v436_v34, %v284_v35  ;;  %v519_v37 = vpop.f32.mrb[1].mxu1 }
 0x207   :  { %v287_v38 = vpop.f32.mrb[2].mxu1 }
 0x208   :  { %v290_v39 = vmax.f32 %v285_v36, 0.0  ;;  %v520_v40 = vpop.f32.mrb[3].mxu1 }
 0x20a   :  { %v291_v41 = vpack.c.bf16 %v290_v39, %v290_v39 }
 0x20c   :  { %538 = vmatmul.mubr.bf16.vlgmr.msra.gmra.mrb[4].mxu0 %v291_v41 }
 0x2df   :  { %v395_v43 = vpop.f32.mrb[4].mxu0 }
 0x2e0   :  { %v396_v44 = vadd.f32 %v445_v42, %v395_v43  ;;  %v539_v45 = vpop.f32.mrb[5].mxu0 }
 0x2e1   :  { %v398_v46 = vpop.f32.mrb[6].mxu0 }
 0x2e2   :  { %401 = vmax.xlane.f32.xlu0 %v396_v44  ;;  %v540_v47 = vpop.f32.mrb[7].mxu0 }
 0x36f   :  { %v402_v48 = vpop.xlane.xlu0 %401 }
 0x370   :  { %v403_v49 = vsub.f32 %v396_v44, %v402_v48 }
 0x372   :  { %v404_v50 = vmul.f32 1.442695, %v403_v49 }
 0x374   :  { %573 = vpow2.f32 %v404_v50 }
 0x37e   :  { %v574_v51 = vpop.eup %573 }
 0x37f   :  { %406 = vadd.xlane.f32.xlu0 %v574_v51 }
 0x40c   :  { %v407_v52 = vpop.xlane.xlu0 %406 }
 0x40d   :  { %575 = vrcp.f32 %v407_v52 }
 0x417   :  { %v576_v53 = vpop.eup %575 }
 0x418   :  { %v409_v54 = vmul.f32 %v576_v53, %v574_v51 }
 0x41a   :  { %410 = vst [vmem:[#allocation8] sm:$0xff] %v409_v54 }
 0x41b   :  { %654 = shalt.err (!%p651_p0)
}
 0x41c   :  { %s655_s22 = scalar_lea.hbm %s832_s7, 128 }
 0x41d   :  { %p656_p1 = scmp.ne.s32.totalorder %s832_s7, %s655_s22  ;;  %p659_p2 = scmp.lt.u32.totalorder %s655_s22, %s832_s7 }
 0x41f   :  { %p661_p3 = pnand %p659_p2, %p656_p1 }
 0x421   :  { %664 = shalt.err (!%p661_p3)
}
 0x422   :  { %420 = dma.vmem_to_hbm [thread:$0]  %s418_s19, 128, %s832_s7, [#allocation4]  }
 0x423   :  { %669 = dma.done.wait [#allocation4], 128  }
 0x424   :  { %670 = vsyncadd [#allocation4], 4294967168 }
 0x425   :  { %424 = vsyncpa [#allocation3], 1 }
 0x426   :  { %425 = vsyncpa [#allocation6], 1 }
 0x427   :  { %426 = vsyncpa [#allocation4], 1 }

</bundles_post_ra>
